<compile_context>
chip_gen: v6e
topology: v6e:2x2x1
jax: 0.10.0
libtpu: 0.0.40
codegen_flags: <defaults>
</compile_context>

<pallas_src>
import math

import jax
import jax.numpy as jnp
from jax.experimental import pallas as pl
from jax.experimental.pallas import tpu as pltpu


def _linear_kernel(x_ref, w_ref, b_ref, o_ref):
    # Hot path: MXU matmul (full K contraction) + broadcast bias add in VMEM.
    acc = jnp.dot(x_ref[...], w_ref[...], preferred_element_type=jnp.float32)
    o_ref[...] = (acc + b_ref[...]).astype(o_ref.dtype)


def _round_up(x, m):
    return (x + m - 1) // m * m


def regression_forward(x, w_t, b, *, block_b=2048, use_bf16_inputs=False):
    """y = x @ w_t + b  (equivalent to torch nn.Linear with weight = w_t.T)

    x:   (B, 1024)
    w_t: (1024, 4)
    b:   (1, 4)
    returns (B, 4) in x's original dtype.
    """
    B, K = x.shape
    Kw, N = w_t.shape
    assert K == Kw and b.shape == (1, N)

    out_dtype = x.dtype

    if use_bf16_inputs:
        # Bandwidth lever: halve x bytes; accumulation stays f32 on the MXU.
        x = x.astype(jnp.bfloat16)
        w_t = w_t.astype(jnp.bfloat16)

    # Batch tile selection:
    #  * sublane-aligned (multiple of 8),
    #  * capped at block_b so 2 double-buffered copies stay well inside the
    #    32 MiB scoped-VMEM budget on every generation (incl. v7x, 64 MiB/TC),
    #  * when the whole batch would fit in <= 2 tiles, split it ~evenly so the
    #    "parallel" grid axis has >= 2 steps and v7x's two TCs both get work.
    if B <= 2 * block_b:
        tb = _round_up(pl.cdiv(B, 2), 8)
    else:
        tb = block_b
    tb = max(8, min(tb, _round_up(block_b, 8)))

    # Ragged-tolerant grid: Pallas pads the tail block's reads and masks the
    # tail block's write-back, so no wrapper-side padding / slicing is needed.
    grid = (pl.cdiv(B, tb),)

    in_itemsize = jnp.dtype(x.dtype).itemsize
    cost = pl.CostEstimate(
        flops=2 * B * K * N,
        transcendentals=0,
        bytes_accessed=B * K * in_itemsize
        + K * N * jnp.dtype(w_t.dtype).itemsize
        + B * N * jnp.dtype(out_dtype).itemsize,
    )

    out = pl.pallas_call(
        _linear_kernel,
        out_shape=jax.ShapeDtypeStruct((B, N), out_dtype),
        grid=grid,
        in_specs=[
            # x tile marches along the batch axis (double-buffered by Pallas).
            pl.BlockSpec((tb, K), lambda i: (i, 0)),
            # Weight and bias stay pinned / resident in VMEM across all steps.
            pl.BlockSpec((K, N), lambda i: (0, 0)),
            pl.BlockSpec((1, N), lambda i: (0, 0)),
        ],
        out_specs=pl.BlockSpec((tb, N), lambda i: (i, 0)),
        compiler_params=pltpu.CompilerParams(
            # Batch axis is embarrassingly parallel -> lets v7x's 2 TCs split it.
            dimension_semantics=("parallel",),
            # ~16 MiB actually used at tb=2048 f32; safe on v5e/v6e (128 MiB
            # physical) and v7x (64 MiB per TC).
            vmem_limit_bytes=32 * 1024 * 1024,
        ),
        cost_estimate=cost,
    )(x, w_t, b)

    return out


def init_params(key, in_features=1024, out_features=4, dtype=jnp.float32):
    # Deterministic init mimicking PyTorch nn.Linear defaults:
    # weight ~ U(-1/sqrt(in), 1/sqrt(in)), bias ~ U(-1/sqrt(in), 1/sqrt(in)).
    kw, kb = jax.random.split(key)
    bound = 1.0 / math.sqrt(in_features)
    # Stored transposed: (in_features, out_features)
    w_t = jax.random.uniform(
        kw, (in_features, out_features), dtype, minval=-bound, maxval=bound
    )
    b = jax.random.uniform(
        kb, (1, out_features), dtype, minval=-bound, maxval=bound
    )
    return w_t, b


if __name__ == "__main__":
    key = jax.random.PRNGKey(0)
    k_x, k_p, k_x2 = jax.random.split(key, 3)

    B, K, N = 2, 1024, 4
    x = jax.random.normal(k_x, (B, K), jnp.float32)
    w_t, b = init_params(k_p, K, N)

    # Small-batch path (B=2 -> single 8-row ragged tile, no wrapper padding).
    y = regression_forward(x, w_t, b)
    jax.block_until_ready(y)
    y_ref = x @ w_t + b
    assert y.shape == (B, N)
    assert jnp.allclose(y, y_ref, atol=1e-5), "mismatch vs. reference (B=2)"

    # Multi-tile path with a ragged batch (grid of 3, partial last block).
    B2 = 20
    x2 = jax.random.normal(k_x2, (B2, K), jnp.float32)
    y2 = regression_forward(x2, w_t, b, block_b=8)
    jax.block_until_ready(y2)
    y2_ref = x2 @ w_t + b
    assert y2.shape == (B2, N)
    assert jnp.allclose(y2, y2_ref, atol=1e-5), "mismatch vs. reference (B=20)"

    # bf16-input path (f32 accumulation): looser tolerance for input rounding.
    y3 = regression_forward(x2, w_t, b, block_b=8, use_bf16_inputs=True)
    jax.block_until_ready(y3)
    assert y3.shape == (B2, N)
    assert y3.dtype == x2.dtype
    assert jnp.allclose(y3, y2_ref, atol=3e-2), "mismatch vs. reference (bf16)"

    print("KERNEL_OK")
</pallas_src>

<mosaic_0001>
module attributes {stable_mosaic.version = 11 : i64} {
  func.func @_linear_kernel(%arg0: i32, %arg1: memref<8x1024xf32, #tpu.memory_space<vmem>>, %arg2: memref<1024x4xf32, #tpu.memory_space<vmem>>, %arg3: memref<1x4xf32, #tpu.memory_space<vmem>>, %arg4: memref<8x4xf32, #tpu.memory_space<vmem>>) attributes {dimension_semantics = [#tpu.dimension_semantics<parallel>], iteration_bounds = array<i64: 1>, scalar_prefetch = 0 : i64, scratch_operands = 0 : i64, tpu.core_type = #tpu.core_type<tc>, window_params = [{transform_indices = @transform_0, window_bounds = array<i64: 8, 1024>}, {pipeline_mode = #tpu.pipeline_mode<synchronous>, transform_indices = @transform_1, window_bounds = array<i64: 1024, 4>}, {pipeline_mode = #tpu.pipeline_mode<synchronous>, transform_indices = @transform_2, window_bounds = array<i64: 1, 4>}, {transform_indices = @transform_3, window_bounds = array<i64: 8, 4>}]} {
    %c0 = arith.constant 0 : index
    %c0_0 = arith.constant 0 : index
    %0 = vector.load %arg1[%c0, %c0_0] : memref<8x1024xf32, #tpu.memory_space<vmem>>, vector<8x1024xf32>
    %c0_1 = arith.constant 0 : index
    %c0_2 = arith.constant 0 : index
    %1 = vector.load %arg2[%c0_1, %c0_2] : memref<1024x4xf32, #tpu.memory_space<vmem>>, vector<1024x4xf32>
    %cst = arith.constant dense<0.000000e+00> : vector<8x4xf32>
    %2 = tpu.matmul %0, %1, %cst {dimension_numbers = #tpu.dot_dimension_numbers<[1], [0], [0], [1], [0, 0, 1, 1], [], []>} : vector<8x1024xf32>, vector<1024x4xf32>, vector<8x4xf32> -> vector<8x4xf32>
    %c0_3 = arith.constant 0 : index
    %c0_4 = arith.constant 0 : index
    %3 = vector.load %arg3[%c0_3, %c0_4] : memref<1x4xf32, #tpu.memory_space<vmem>>, vector<1x4xf32>
    %4 = vector.broadcast %3 : vector<1x4xf32> to vector<8x4xf32>
    %5 = arith.addf %2, %4 : vector<8x4xf32>
    %c0_5 = arith.constant 0 : index
    %c0_6 = arith.constant 0 : index
    %6 = vector.load %arg4[%c0_5, %c0_6] : memref<8x4xf32, #tpu.memory_space<vmem>>, vector<8x4xf32>
    tpu.vector_store %arg4[%c0_5, %c0_6], %5 {strides = array<i32>} : memref<8x4xf32, #tpu.memory_space<vmem>>, vector<8x4xf32>,
    return
  }
  func.func @transform_0(%arg0: i32) -> (i32, i32) {
    %c0_i32 = arith.constant 0 : i32
    %c0_i32_0 = arith.constant 0 : i32
    return %arg0, %c0_i32 : i32, i32
  }
  func.func @transform_1(%arg0: i32) -> (i32, i32) {
    %c0_i32 = arith.constant 0 : i32
    %c0_i32_0 = arith.constant 0 : i32
    %c0_i32_1 = arith.constant 0 : i32
    return %c0_i32, %c0_i32_0 : i32, i32
  }
  func.func @transform_2(%arg0: i32) -> (i32, i32) {
    %c0_i32 = arith.constant 0 : i32
    %c0_i32_0 = arith.constant 0 : i32
    %c0_i32_1 = arith.constant 0 : i32
    return %c0_i32, %c0_i32_0 : i32, i32
  }
  func.func @transform_3(%arg0: i32) -> (i32, i32) {
    %c0_i32 = arith.constant 0 : i32
    %c0_i32_0 = arith.constant 0 : i32
    return %arg0, %c0_i32 : i32, i32
  }
}

</mosaic_0001>

<bundles_post_ra>
// kernel: tpu_custom_call.1
= control target key start
LH: loop header
LB: loop body
LE: loop exit
PB: predicated region body
PF: predicated region fallthrough
CT: control target
= control target key end

     0   :  { %8 = vsyncpa [#allocation3], 0  ;;  %v723_v30 = vmov 1983009808   ;;  %v173_v32 = vlaneseq  ;;  %vm526_vm0 = vcmask 31744   ;;  %s1171_s0 = inlined_call_operand.vmem [shape: f32[2,1024], index: 0, kind: input, shape index: {}]   ;;  %s1172_s1 = inlined_call_operand.vmem [shape: f32[1024,4], index: 1, kind: input, shape index: {}]   ;;  %s1173_s2 = inlined_call_operand.vmem [shape: f32[1,4], index: 2, kind: input, shape index: {}]   ;;  %s1174_s3 = inlined_call_operand.hbm [shape: f32[2,4], index: 3, kind: output, shape index: {}]  }
   0x1   :  { %v54_v0 = vld [vmem:[%s1172_s1 + $0xf8] sm:$0xff]  ;;  %v53_v4 = vld [vmem:[%s1172_s1 + $0xf0] sm:$0xff]  ;;  %v52_v8 = vld [vmem:[%s1172_s1 + $0xe8] sm:$0xff]  ;;  %v171_v31 = vunpack.c.l.s4 %v723_v30 }
   0x2   :  { %v86_v1 = vld [vmem:[%s1172_s1 + $0x1f8] sm:$0xff]  ;;  %545 = vmatprep.subr.mxu0 %v54_v0  ;;  %v85_v5 = vld [vmem:[%s1172_s1 + $0x1f0] sm:$0xff]  ;;  %v84_v9 = vld [vmem:[%s1172_s1 + $0x1e8] sm:$0xff]  ;;  %v174_v42 = vshrl.u32 %v173_v32, 7 }
   0x3   :  { %580 = vmatprep.subr.mxu1 %v86_v1  ;;  %v38_v2 = vld [vmem:[%s1172_s1 + $0x78] sm:$0xff]  ;;  %v37_v6 = vld [vmem:[%s1172_s1 + $0x70] sm:$0xff]  ;;  %v36_v10 = vld [vmem:[%s1172_s1 + $0x68] sm:$0xff]  ;;  %v172_v41 = vunpack.c.0.s8 %v171_v31 }
   0x4   :  { %v70_v3 = vld [vmem:[%s1172_s1 + $0x178] sm:$0xff]  ;;  %546 = vmatpush3.msra.mxu0 %v38_v2  ;;  %v69_v7 = vld [vmem:[%s1172_s1 + $0x170] sm:$0xff]  ;;  %v68_v11 = vld [vmem:[%s1172_s1 + $0x168] sm:$0xff] }
   0x5   :  { %581 = vmatpush3.msra.mxu1 %v70_v3  ;;  %547 = vmatprep.subr.mxu0 %v53_v4  ;;  %v51_v12 = vld [vmem:[%s1172_s1 + $0xe0] sm:$0xff]  ;;  %v50_v16 = vld [vmem:[%s1172_s1 + $0xd8] sm:$0xff]  ;;  %v49_v20 = vld [vmem:[%s1172_s1 + $0xd0] sm:$0xff]  ;;  %v897_v55 = vsub.s32 %v172_v41, %v174_v42 }
   0x6   :  { %582 = vmatprep.subr.mxu1 %v85_v5  ;;  %548 = vmatpush3.msra.mxu0 %v37_v6  ;;  %v83_v13 = vld [vmem:[%s1172_s1 + $0x1e0] sm:$0xff]  ;;  %v82_v17 = vld [vmem:[%s1172_s1 + $0x1d8] sm:$0xff]  ;;  %v81_v21 = vld [vmem:[%s1172_s1 + $0x1d0] sm:$0xff] }
   0x7   :  { %583 = vmatpush3.msra.mxu1 %v69_v7  ;;  %549 = vmatprep.subr.mxu0 %v52_v8  ;;  %v35_v14 = vld [vmem:[%s1172_s1 + $0x60] sm:$0xff]  ;;  %v34_v18 = vld [vmem:[%s1172_s1 + $0x58] sm:$0xff]  ;;  %v33_v22 = vld [vmem:[%s1172_s1 + $0x50] sm:$0xff] }
   0x8   :  { %584 = vmatprep.subr.mxu1 %v84_v9  ;;  %v67_v15 = vld [vmem:[%s1172_s1 + $0x160] sm:$0xff]  ;;  %550 = vmatpush3.msra.mxu0 %v36_v10  ;;  %v66_v19 = vld [vmem:[%s1172_s1 + $0x158] sm:$0xff]  ;;  %v65_v23 = vld [vmem:[%s1172_s1 + $0x150] sm:$0xff] }
   0x9   :  { %585 = vmatpush3.msra.mxu1 %v68_v11  ;;  %551 = vmatprep.subr.mxu0 %v51_v12  ;;  %v48_v24 = vld [vmem:[%s1172_s1 + $0xc8] sm:$0xff]  ;;  %v47_v28 = vld [vmem:[%s1172_s1 + $0xc0] sm:$0xff]  ;;  %v46_v35 = vld [vmem:[%s1172_s1 + $0xb8] sm:$0xff] }
   0xa   :  { %586 = vmatprep.subr.mxu1 %v83_v13  ;;  %552 = vmatpush3.msra.mxu0 %v35_v14  ;;  %v80_v25 = vld [vmem:[%s1172_s1 + $0x1c8] sm:$0xff]  ;;  %v79_v29 = vld [vmem:[%s1172_s1 + $0x1c0] sm:$0xff]  ;;  %v78_v36 = vld [vmem:[%s1172_s1 + $0x1b8] sm:$0xff] }
   0xb   :  { %587 = vmatpush3.msra.mxu1 %v67_v15  ;;  %553 = vmatprep.subr.mxu0 %v50_v16  ;;  %v32_v26 = vld [vmem:[%s1172_s1 + $0x48] sm:$0xff]  ;;  %v31_v33 = vld [vmem:[%s1172_s1 + $0x40] sm:$0xff]  ;;  %v30_v37 = vld [vmem:[%s1172_s1 + $0x38] sm:$0xff] }
   0xc   :  { %588 = vmatprep.subr.mxu1 %v82_v17  ;;  %554 = vmatpush3.msra.mxu0 %v34_v18  ;;  %v64_v27 = vld [vmem:[%s1172_s1 + $0x148] sm:$0xff]  ;;  %v63_v34 = vld [vmem:[%s1172_s1 + $0x140] sm:$0xff]  ;;  %v62_v38 = vld [vmem:[%s1172_s1 + $0x138] sm:$0xff] }
   0xd   :  { %589 = vmatpush3.msra.mxu1 %v66_v19  ;;  %555 = vmatprep.subr.mxu0 %v49_v20  ;;  %v45_v39 = vld [vmem:[%s1172_s1 + $0xb0] sm:$0xff]  ;;  %v44_v45 = vld [vmem:[%s1172_s1 + $0xa8] sm:$0xff]  ;;  %v43_v49 = vld [vmem:[%s1172_s1 + $0xa0] sm:$0xff] }
   0xe   :  { %590 = vmatprep.subr.mxu1 %v81_v21  ;;  %556 = vmatpush3.msra.mxu0 %v33_v22  ;;  %v77_v40 = vld [vmem:[%s1172_s1 + $0x1b0] sm:$0xff]  ;;  %v76_v46 = vld [vmem:[%s1172_s1 + $0x1a8] sm:$0xff]  ;;  %v75_v50 = vld [vmem:[%s1172_s1 + $0x1a0] sm:$0xff] }
   0xf   :  { %591 = vmatpush3.msra.mxu1 %v65_v23  ;;  %557 = vmatprep.subr.mxu0 %v48_v24  ;;  %v29_v43 = vld [vmem:[%s1172_s1 + $0x30] sm:$0xff]  ;;  %v28_v47 = vld [vmem:[%s1172_s1 + $0x28] sm:$0xff]  ;;  %v27_v51 = vld [vmem:[%s1172_s1 + $0x20] sm:$0xff] }
  0x10   :  { %592 = vmatprep.subr.mxu1 %v80_v25  ;;  %558 = vmatpush3.msra.mxu0 %v32_v26  ;;  %v61_v44 = vld [vmem:[%s1172_s1 + $0x130] sm:$0xff]  ;;  %v60_v48 = vld [vmem:[%s1172_s1 + $0x128] sm:$0xff]  ;;  %v59_v52 = vld [vmem:[%s1172_s1 + $0x120] sm:$0xff] }
  0x11   :  { %593 = vmatpush3.msra.mxu1 %v64_v27  ;;  %559 = vmatprep.subr.mxu0 %v47_v28  ;;  %v42_v53 = vld [vmem:[%s1172_s1 + $0x98] sm:$0xff]  ;;  %v689_v57 = vld [vmem:[%s1171_s0] ss:$16 sps:$4 sm:$0xff]   ;;  %v693_v60 = vld [vmem:[%s1171_s0 + $0x4] ss:$16 sps:$4 sm:$0xff]  }
  0x12   :  { %594 = vmatprep.subr.mxu1 %v79_v29  ;;  %560 = vmatpush3.msra.mxu0 %v31_v33  ;;  %v74_v54 = vld [vmem:[%s1172_s1 + $0x198] sm:$0xff]  ;;  %v691_v59 = vld [vmem:[%s1171_s0 + $0x20] ss:$16 sps:$4 sm:$0xff]   ;;  %v176_v63 = vrot.slane %v689_v57, %v897_v55  ;;  %v694_v0 = vld [vmem:[%s1171_s0 + $0x24] ss:$16 sps:$4 sm:$0xff]   ;;  %v183_v6 = vrot.slane %v693_v60, %v897_v55 }
  0x13   :  { %595 = vmatpush3.msra.mxu1 %v63_v34  ;;  %561 = vmatprep.subr.mxu0 %v46_v35  ;;  %v26_v56 = vld [vmem:[%s1172_s1 + $0x18] sm:$0xff]  ;;  %v41_v61 = vld [vmem:[%s1172_s1 + $0x90] sm:$0xff]  ;;  %v190_v3 = vrot.slane %v691_v59, %v897_v55  ;;  %v40_v4 = vld [vmem:[%s1172_s1 + $0x88] sm:$0xff]  ;;  %v197_v7 = vrot.slane %v694_v0, %v897_v55 }
  0x14   :  { %596 = vmatprep.subr.mxu1 %v78_v36  ;;  %562 = vmatpush3.msra.mxu0 %v30_v37  ;;  %v58_v58 = vld [vmem:[%s1172_s1 + $0x118] sm:$0xff]  ;;  %v73_v62 = vld [vmem:[%s1172_s1 + $0x190] sm:$0xff]  ;;  %v72_v5 = vld [vmem:[%s1172_s1 + $0x188] sm:$0xff] }
  0x15   :  { %597 = vmatpush3.msra.mxu1 %v62_v38  ;;  %563 = vmatprep.subr.mxu0 %v45_v39  ;;  %v25_v1 = vld [vmem:[%s1172_s1 + $0x10] sm:$0xff]  ;;  %v24_v8 = vld [vmem:[%s1172_s1 + $0x8] sm:$0xff]  ;;  %v39_v10 = vld [vmem:[%s1172_s1 + $0x80] sm:$0xff]  ;;  %v199_v12 = vcombine.high %v176_v63, %v190_v3  ;;  %v198_v14 = vcombine.low %v176_v63, %v190_v3  ;;  %v201_v16 = vcombine.high %v183_v6, %v197_v7 }
  0x16   :  { %598 = vmatprep.subr.mxu1 %v77_v40  ;;  %564 = vmatpush3.msra.mxu0 %v29_v43  ;;  %v57_v2 = vld [vmem:[%s1172_s1 + $0x110] sm:$0xff]  ;;  %v56_v9 = vld [vmem:[%s1172_s1 + $0x108] sm:$0xff]  ;;  %v71_v11 = vld [vmem:[%s1172_s1 + $0x180] sm:$0xff]  ;;  %v200_v18 = vcombine.low %v183_v6, %v197_v7 }
  0x17   :  { %599 = vmatpush3.msra.mxu1 %v61_v44  ;;  %565 = vmatprep.subr.mxu0 %v44_v45  ;;  %v23_v13 = vld [vmem:[%s1172_s1] sm:$0xff]  ;;  %v118_v17 = vld [vmem:[%s1172_s1 + $0x2f8] sm:$0xff]  ;;  %v117_v22 = vld [vmem:[%s1172_s1 + $0x2f0] sm:$0xff] }
  0x18   :  { %600 = vmatprep.subr.mxu1 %v76_v46  ;;  %566 = vmatpush3.msra.mxu0 %v28_v47  ;;  %v55_v15 = vld [vmem:[%s1172_s1 + $0x100] sm:$0xff]  ;;  %v150_v19 = vld [vmem:[%s1172_s1 + $0x3f8] sm:$0xff]  ;;  %v149_v23 = vld [vmem:[%s1172_s1 + $0x3f0] sm:$0xff] }
  0x19   :  { %601 = vmatpush3.msra.mxu1 %v60_v48  ;;  %567 = vmatprep.subr.mxu0 %v43_v49  ;;  %v102_v20 = vld [vmem:[%s1172_s1 + $0x278] sm:$0xff]  ;;  %v101_v24 = vld [vmem:[%s1172_s1 + $0x270] sm:$0xff]  ;;  %v116_v26 = vld [vmem:[%s1172_s1 + $0x2e8] sm:$0xff] }
  0x1a   :  { %602 = vmatprep.subr.mxu1 %v75_v50  ;;  %568 = vmatpush3.msra.mxu0 %v27_v51  ;;  %v134_v21 = vld [vmem:[%s1172_s1 + $0x378] sm:$0xff]  ;;  %v133_v25 = vld [vmem:[%s1172_s1 + $0x370] sm:$0xff]  ;;  %v148_v27 = vld [vmem:[%s1172_s1 + $0x3e8] sm:$0xff] }
  0x1b   :  { %603 = vmatpush3.msra.mxu1 %v59_v52  ;;  %569 = vmatprep.subr.mxu0 %v42_v53  ;;  %v100_v28 = vld [vmem:[%s1172_s1 + $0x268] sm:$0xff]  ;;  %v115_v30 = vld [vmem:[%s1172_s1 + $0x2e0] sm:$0xff]  ;;  %v114_v34 = vld [vmem:[%s1172_s1 + $0x2d8] sm:$0xff] }
  0x1c   :  { %604 = vmatprep.subr.mxu1 %v74_v54  ;;  %570 = vmatpush3.msra.mxu0 %v26_v56  ;;  %v132_v29 = vld [vmem:[%s1172_s1 + $0x368] sm:$0xff]  ;;  %v147_v31 = vld [vmem:[%s1172_s1 + $0x3e0] sm:$0xff]  ;;  %v146_v35 = vld [vmem:[%s1172_s1 + $0x3d8] sm:$0xff] }
  0x1d   :  { %605 = vmatpush3.msra.mxu1 %v58_v58  ;;  %571 = vmatprep.subr.mxu0 %v41_v61  ;;  %v99_v32 = vld [vmem:[%s1172_s1 + $0x260] sm:$0xff]  ;;  %v98_v36 = vld [vmem:[%s1172_s1 + $0x258] sm:$0xff]  ;;  %v113_v38 = vld [vmem:[%s1172_s1 + $0x2d0] sm:$0xff] }
  0x1e   :  { %606 = vmatprep.subr.mxu1 %v73_v62  ;;  %572 = vmatpush3.msra.mxu0 %v25_v1  ;;  %v131_v33 = vld [vmem:[%s1172_s1 + $0x360] sm:$0xff]  ;;  %v130_v37 = vld [vmem:[%s1172_s1 + $0x358] sm:$0xff]  ;;  %v145_v39 = vld [vmem:[%s1172_s1 + $0x3d0] sm:$0xff] }
  0x1f   :  { %607 = vmatpush3.msra.mxu1 %v57_v2  ;;  %573 = vmatprep.subr.mxu0 %v40_v4  ;;  %v97_v40 = vld [vmem:[%s1172_s1 + $0x250] sm:$0xff]  ;;  %v112_v42 = vld [vmem:[%s1172_s1 + $0x2c8] sm:$0xff]  ;;  %v111_v46 = vld [vmem:[%s1172_s1 + $0x2c0] sm:$0xff] }
  0x20   :  { %608 = vmatprep.subr.mxu1 %v72_v5  ;;  %574 = vmatpush3.msra.mxu0 %v24_v8  ;;  %v129_v41 = vld [vmem:[%s1172_s1 + $0x350] sm:$0xff]  ;;  %v144_v43 = vld [vmem:[%s1172_s1 + $0x3c8] sm:$0xff]  ;;  %v143_v47 = vld [vmem:[%s1172_s1 + $0x3c0] sm:$0xff] }
  0x21   :  { %609 = vmatpush3.msra.mxu1 %v56_v9  ;;  %575 = vmatprep.subr.mxu0 %v39_v10  ;;  %v96_v44 = vld [vmem:[%s1172_s1 + $0x248] sm:$0xff]  ;;  %v95_v48 = vld [vmem:[%s1172_s1 + $0x240] sm:$0xff]  ;;  %v110_v50 = vld [vmem:[%s1172_s1 + $0x2b8] sm:$0xff] }
  0x22   :  { %610 = vmatprep.subr.mxu1 %v71_v11  ;;  %576 = vmatpush3.msra.mxu0 %v23_v13  ;;  %v128_v45 = vld [vmem:[%s1172_s1 + $0x348] sm:$0xff]  ;;  %v127_v49 = vld [vmem:[%s1172_s1 + $0x340] sm:$0xff]  ;;  %v142_v51 = vld [vmem:[%s1172_s1 + $0x3b8] sm:$0xff] }
  0x23   :  { %310 = vmatprep.mubr.f32.mxu0 %v199_v12  ;;  %611 = vmatpush3.msra.mxu1 %v55_v15  ;;  %v94_v52 = vld [vmem:[%s1172_s1 + $0x238] sm:$0xff]  ;;  %v109_v54 = vld [vmem:[%s1172_s1 + $0x2b0] sm:$0xff]  ;;  %v108_v59 = vld [vmem:[%s1172_s1 + $0x2a8] sm:$0xff] }
  0x24   :  { %311 = vmatmul.mubr.f32.vlgmr.msra.gmra.mxu0 %v198_v14  ;;  %380 = vmatprep.mubr.f32.mxu1 %v201_v16  ;;  %v126_v53 = vld [vmem:[%s1172_s1 + $0x338] sm:$0xff]  ;;  %v141_v56 = vld [vmem:[%s1172_s1 + $0x3b0] sm:$0xff]  ;;  %v140_v60 = vld [vmem:[%s1172_s1 + $0x3a8] sm:$0xff] }
  0x25   :  { %615 = vmatprep.subr.mxu0 %v118_v17  ;;  %650 = vmatprep.subr.mxu1 %v150_v19  ;;  %v93_v57 = vld [vmem:[%s1172_s1 + $0x230] sm:$0xff]  ;;  %v92_v61 = vld [vmem:[%s1172_s1 + $0x228] sm:$0xff]  ;;  %v107_v63 = vld [vmem:[%s1172_s1 + $0x2a0] sm:$0xff] }
  0x26   :  { %381 = vmatmul.mubr.f32.vlgmr.msra.gmra.mxu1 %v200_v18  ;;  %616 = vmatpush3.msra.mxu0 %v102_v20  ;;  %v125_v58 = vld [vmem:[%s1172_s1 + $0x330] sm:$0xff]  ;;  %v124_v62 = vld [vmem:[%s1172_s1 + $0x328] sm:$0xff]  ;;  %v139_v0 = vld [vmem:[%s1172_s1 + $0x3a0] sm:$0xff] }
  0x27   :  { %651 = vmatpush3.msra.mxu1 %v134_v21  ;;  %617 = vmatprep.subr.mxu0 %v117_v22  ;;  %v91_v1 = vld [vmem:[%s1172_s1 + $0x220] sm:$0xff]  ;;  %v695_v2 = vld [vmem:[%s1171_s0 + $0x8] ss:$16 sps:$4 sm:$0xff]   ;;  %v699_v5 = vld [vmem:[%s1171_s0 + $0xc] ss:$16 sps:$4 sm:$0xff]  }
  0x28   :  { %652 = vmatprep.subr.mxu1 %v149_v23  ;;  %618 = vmatpush3.msra.mxu0 %v101_v24  ;;  %v697_v3 = vld [vmem:[%s1171_s0 + $0x28] ss:$16 sps:$4 sm:$0xff]   ;;  %v123_v4 = vld [vmem:[%s1172_s1 + $0x320] sm:$0xff]  ;;  %v700_v6 = vld [vmem:[%s1171_s0 + $0x2c] ss:$16 sps:$4 sm:$0xff]   ;;  %v212_v13 = vrot.slane %v695_v2, %v897_v55  ;;  %v219_v17 = vrot.slane %v699_v5, %v897_v55 }
  0x29   :  { %653 = vmatpush3.msra.mxu1 %v133_v25  ;;  %619 = vmatprep.subr.mxu0 %v116_v26  ;;  %v106_v7 = vld [vmem:[%s1172_s1 + $0x298] sm:$0xff]  ;;  %v105_v11 = vld [vmem:[%s1172_s1 + $0x290] sm:$0xff]  ;;  %v226_v14 = vrot.slane %v697_v3, %v897_v55  ;;  %v233_v18 = vrot.slane %v700_v6, %v897_v55  ;;  %v104_v19 = vld [vmem:[%s1172_s1 + $0x288] sm:$0xff] }
  0x2a   :  { %654 = vmatprep.subr.mxu1 %v148_v27  ;;  %620 = vmatpush3.msra.mxu0 %v100_v28  ;;  %v138_v8 = vld [vmem:[%s1172_s1 + $0x398] sm:$0xff]  ;;  %v137_v12 = vld [vmem:[%s1172_s1 + $0x390] sm:$0xff]  ;;  %v136_v20 = vld [vmem:[%s1172_s1 + $0x388] sm:$0xff] }
  0x2b   :  { %655 = vmatpush3.msra.mxu1 %v132_v29  ;;  %621 = vmatprep.subr.mxu0 %v115_v30  ;;  %v90_v9 = vld [vmem:[%s1172_s1 + $0x218] sm:$0xff]  ;;  %v89_v15 = vld [vmem:[%s1172_s1 + $0x210] sm:$0xff]  ;;  %v88_v21 = vld [vmem:[%s1172_s1 + $0x208] sm:$0xff]  ;;  %v235_v24 = vcombine.high %v212_v13, %v226_v14  ;;  %v237_v26 = vcombine.high %v219_v17, %v233_v18  ;;  %v234_v28 = vcombine.low %v212_v13, %v226_v14 }
  0x2c   :  { %656 = vmatprep.subr.mxu1 %v147_v31  ;;  %622 = vmatpush3.msra.mxu0 %v99_v32  ;;  %v122_v10 = vld [vmem:[%s1172_s1 + $0x318] sm:$0xff]  ;;  %v121_v16 = vld [vmem:[%s1172_s1 + $0x310] sm:$0xff]  ;;  %v120_v55 = vld [vmem:[%s1172_s1 + $0x308] sm:$0xff]  ;;  %v236_v29 = vcombine.low %v219_v17, %v233_v18 }
  0x2d   :  { %657 = vmatpush3.msra.mxu1 %v131_v33  ;;  %623 = vmatprep.subr.mxu0 %v114_v34  ;;  %v103_v22 = vld [vmem:[%s1172_s1 + $0x280] sm:$0xff] }
  0x2e   :  { %658 = vmatprep.subr.mxu1 %v146_v35  ;;  %624 = vmatpush3.msra.mxu0 %v98_v36  ;;  %v135_v23 = vld [vmem:[%s1172_s1 + $0x380] sm:$0xff] }
  0x2f   :  { %659 = vmatpush3.msra.mxu1 %v130_v37  ;;  %625 = vmatprep.subr.mxu0 %v113_v38  ;;  %v87_v25 = vld [vmem:[%s1172_s1 + $0x200] sm:$0xff] }
  0x30   :  { %660 = vmatprep.subr.mxu1 %v145_v39  ;;  %626 = vmatpush3.msra.mxu0 %v97_v40  ;;  %v119_v27 = vld [vmem:[%s1172_s1 + $0x300] sm:$0xff] }
  0x31   :  { %661 = vmatpush3.msra.mxu1 %v129_v41  ;;  %627 = vmatprep.subr.mxu0 %v112_v42  ;;  %v544_v34 = vld [vmem:[%s1173_s2] ss:$0 sm:$0xff] }
  0x32   :  { %662 = vmatprep.subr.mxu1 %v144_v43  ;;  %628 = vmatpush3.msra.mxu0 %v96_v44 }
  0x33   :  { %663 = vmatpush3.msra.mxu1 %v128_v45  ;;  %629 = vmatprep.subr.mxu0 %v111_v46 }
  0x34   :  { %664 = vmatprep.subr.mxu1 %v143_v47  ;;  %630 = vmatpush3.msra.mxu0 %v95_v48 }
  0x35   :  { %665 = vmatpush3.msra.mxu1 %v127_v49  ;;  %631 = vmatprep.subr.mxu0 %v110_v50 }
  0x36   :  { %666 = vmatprep.subr.mxu1 %v142_v51  ;;  %632 = vmatpush3.msra.mxu0 %v94_v52 }
  0x37   :  { %667 = vmatpush3.msra.mxu1 %v126_v53  ;;  %633 = vmatprep.subr.mxu0 %v109_v54 }
  0x38   :  { %668 = vmatprep.subr.mxu1 %v141_v56  ;;  %634 = vmatpush3.msra.mxu0 %v93_v57 }
  0x39   :  { %669 = vmatpush3.msra.mxu1 %v125_v58  ;;  %635 = vmatprep.subr.mxu0 %v108_v59 }
  0x3a   :  { %670 = vmatprep.subr.mxu1 %v140_v60  ;;  %636 = vmatpush3.msra.mxu0 %v92_v61 }
  0x3b   :  { %671 = vmatpush3.msra.mxu1 %v124_v62  ;;  %637 = vmatprep.subr.mxu0 %v107_v63 }
  0x3c   :  { %672 = vmatprep.subr.mxu1 %v139_v0  ;;  %638 = vmatpush3.msra.mxu0 %v91_v1 }
  0x3d   :  { %673 = vmatpush3.msra.mxu1 %v123_v4  ;;  %639 = vmatprep.subr.mxu0 %v106_v7 }
  0x3e   :  { %674 = vmatprep.subr.mxu1 %v138_v8  ;;  %640 = vmatpush3.msra.mxu0 %v90_v9 }
  0x3f   :  { %675 = vmatpush3.msra.mxu1 %v122_v10  ;;  %641 = vmatprep.subr.mxu0 %v105_v11 }
  0x40   :  { %676 = vmatprep.subr.mxu1 %v137_v12  ;;  %642 = vmatpush3.msra.mxu0 %v89_v15 }
  0x41   :  { %677 = vmatpush3.msra.mxu1 %v121_v16  ;;  %643 = vmatprep.subr.mxu0 %v104_v19 }
  0x42   :  { %678 = vmatprep.subr.mxu1 %v136_v20  ;;  %644 = vmatpush3.msra.mxu0 %v88_v21 }
  0x43   :  { %679 = vmatpush3.msra.mxu1 %v120_v55  ;;  %645 = vmatprep.subr.mxu0 %v103_v22 }
  0x44   :  { %680 = vmatprep.subr.mxu1 %v135_v23  ;;  %646 = vmatpush3.msra.mxu0 %v87_v25 }
  0x45   :  { %450 = vmatprep.mubr.f32.mxu0 %v235_v24  ;;  %681 = vmatpush3.msra.mxu1 %v119_v27 }
  0x46   :  { %520 = vmatprep.mubr.f32.mxu1 %v237_v26  ;;  %451 = vmatmul.mubr.f32.vlgmr.msra.gmra.mxu0 %v234_v28 }
  0x47   :  { %521 = vmatmul.mubr.f32.vlgmr.msra.gmra.mxu1 %v236_v29 }
  0xe4   :  { %v577_v30 = vpop.f32.mrf.mxu0 }
  0xe6   :  { %v612_v31 = vpop.f32.mrf.mxu1  ;;  %v578_v32 = vpop.f32.mrf.mxu0 }
  0xe7   :  { %v579_v33 = vadd.f32 %v578_v32, %v577_v30 }
  0xe8   :  { %v613_v35 = vpop.f32.mrf.mxu1 }
  0xe9   :  { %v313_v36 = vadd.f32 %v579_v33, %v544_v34  ;;  %v614_v37 = vadd.f32 %v613_v35, %v612_v31 }
  0xeb   :  { %v383_v42 = vadd.f32 %v614_v37, %v313_v36 }
 0x106   :  { %v647_v38 = vpop.f32.mrf.mxu0 }
 0x107   :  { %v682_v39 = vpop.f32.mrf.mxu1 }
 0x108   :  { %v648_v40 = vpop.f32.mrf.mxu0 }
 0x109   :  { %v683_v41 = vpop.f32.mrf.mxu1  ;;  %v649_v43 = vadd.f32 %v648_v40, %v647_v38 }
 0x10a   :  { %v684_v45 = vadd.f32 %v683_v41, %v682_v39 }
 0x10b   :  { %v453_v44 = vadd.f32 %v649_v43, %v383_v42 }
 0x10d   :  { %v523_v46 = vadd.f32 %v684_v45, %v453_v44 }
 0x10f   :  { %527 = vst.msk [vmem:[#allocation2] sm:$0xff] %vm526_vm0, %v523_v46 }
 0x110   :  { %532 = vsyncadd [#allocation3], 96  ;;  %s724_s1 = smov [#allocation2]  }
 0x111   :  { %s533_s15 = sshll.u32 %s724_s1, 4  ;;  %s534_s15 = int_to_ptr.vmem [resolvable:$true] %s533_s15 }
 0x112   :  { %s701_s16 = scalar_lea.vmem %s534_s15, 32  ;;  %s705_s2 = scalar_lea.vmem %s534_s15, 128 }
 0x113   :  { %p702_p0 = scmp.ne.s32.totalorder %s534_s15, %s701_s16  ;;  %p706_p1 = scmp.lt.s32.totalorder %s534_s15, %s534_s15 }
 0x114   :  { %p707_p2 = scmp.lt.s32.totalorder %s705_s2, %s701_s16 }
 0x116   :  { %p708_p3 = por %p707_p2, %p706_p1 }
 0x118   :  { %p709_p4 = pnand %p708_p3, %p702_p0 }
 0x11a   :  { %712 = shalt.err (!%p709_p4)
}
 0x11b   :  { %s725_s0 = smov 32   ;;  %s726_s17 = smov 2  }
 0x11c   :  { %539 = dma.vmem_to_hbm [thread:$0]  %s534_s15, 32, %s1174_s3, [#allocation3], %s725_s0, %s725_s0, %s726_s17  }
 0x11d   :  { %721 = dma.done.wait [#allocation3], 128  }
 0x11e   :  { %722 = vsyncadd [#allocation3], 4294967168 }
 0x11f   :  { %543 = vsyncpa [#allocation3], 1 }

</bundles_post_ra>
